<compile_context>
chip_gen: v5e
topology: v5e:2x2
jax: 0.10.0
libtpu: 0.0.40
codegen_flags: <defaults>
</compile_context>

<pallas_src>
import functools

import jax
import jax.numpy as jnp
from jax import lax
from jax.experimental import pallas as pl
from jax.experimental.pallas import tpu as pltpu


def _linear_layernorm_kernel(x_ref, w_ref, b_ref, g_ref, beta_ref, o_ref,
                             *, eps, inv_out_c, mxu_dtype):
    """One (C, tile_p) pixel slab: Linear over channels + channels-last LayerNorm."""
    x = x_ref[0]                                    # (C, tile_p)  pixels on lanes
    w = w_ref[...]                                  # (outC, C)    torch Linear layout

    # Linear: z[o, p] = sum_c w[o, c] * x[c, p]   (MXU, bf16 feed, f32 accumulate)
    z = jnp.dot(w.astype(mxu_dtype), x.astype(mxu_dtype),
                preferred_element_type=jnp.float32)
    z = z + b_ref[...].astype(jnp.float32)          # (outC, 1) broadcasts over lanes

    # LayerNorm over channels (axis 0) — fused single-pass statistics,
    # biased variance, eps inside the sqrt (matches F.layer_norm).
    s1 = jnp.sum(z, axis=0, keepdims=True)          # (1, tile_p)
    s2 = jnp.sum(z * z, axis=0, keepdims=True)
    mean = s1 * inv_out_c
    var = s2 * inv_out_c - mean * mean
    y = (z - mean) * lax.rsqrt(var + eps)
    y = y * g_ref[...].astype(jnp.float32) + beta_ref[...].astype(jnp.float32)

    o_ref[0] = y.astype(o_ref.dtype)


def _pick_tile_p(P, target=256):
    """Largest 128-multiple <= target that we tile the pixel axis with."""
    if P <= 128:
        return P
    return min(target, (P // 128) * 128)


def upsample_convnext(x_nchw, params, *, ratio=1, eps=1e-6,
                      use_bf16_matmul=True, tile_p=None):
    """params = (w1 (outC,inC), b1 (outC,1), ln_w (outC,1), ln_b (outC,1))."""
    w1, b1, ln_w, ln_b = params
    N, C, H, W = x_nchw.shape
    out_c = w1.shape[0]
    P = H * W

    x_flat = x_nchw.reshape(N, C, P)                # contiguous collapse: no HBM pass

    if tile_p is None:
        tile_p = _pick_tile_p(P)
    grid = (N, pl.cdiv(P, tile_p))

    mxu_dtype = jnp.bfloat16 if use_bf16_matmul else x_nchw.dtype
    kernel = functools.partial(_linear_layernorm_kernel, eps=eps,
                               inv_out_c=1.0 / out_c, mxu_dtype=mxu_dtype)

    def param_spec(arr):
        nd = arr.ndim
        return pl.BlockSpec(arr.shape, lambda b, p: (0,) * nd)

    itemsize = x_nchw.dtype.itemsize
    param_bytes = sum(int(a.size) * a.dtype.itemsize for a in (w1, b1, ln_w, ln_b))
    block_bytes = (C + out_c) * tile_p * itemsize           # one in + one out block
    scratch_bytes = 8 * out_c * tile_p * 4                  # f32 intermediates
    est_vmem = 2 * block_bytes + 2 * param_bytes + scratch_bytes
    vmem_limit = int(min(48 * 1024 * 1024, max(16 * 1024 * 1024, 2 * est_vmem)))

    cost = pl.CostEstimate(
        flops=2 * N * P * C * out_c + 10 * N * P * out_c,
        transcendentals=N * P,                               # rsqrt per pixel
        bytes_accessed=int(N * C * P * itemsize + N * out_c * P * itemsize
                           + param_bytes),
    )

    y_flat = pl.pallas_call(
        kernel,
        out_shape=jax.ShapeDtypeStruct((N, out_c, P), x_nchw.dtype),
        grid=grid,
        in_specs=[
            pl.BlockSpec((1, C, tile_p), lambda b, p: (b, 0, p)),
            param_spec(w1),
            param_spec(b1),
            param_spec(ln_w),
            param_spec(ln_b),
        ],
        out_specs=pl.BlockSpec((1, out_c, tile_p), lambda b, p: (b, 0, p)),
        compiler_params=pltpu.CompilerParams(
            dimension_semantics=("parallel", "parallel"),
            vmem_limit_bytes=vmem_limit),
        cost_estimate=cost,
    )(x_flat, w1, b1, ln_w, ln_b)

    y = y_flat.reshape(N, out_c, H, W)              # contiguous collapse: no HBM pass

    # nearest-neighbour upsample by s = 2**ratio (pure replication, done by XLA
    # on the small kernel output; the expanded write is mandatory either way).
    s = 2 ** ratio
    y = jnp.broadcast_to(y[:, :, :, None, :, None], (N, out_c, H, s, W, s))
    return y.reshape(N, out_c, H * s, W * s)


def init_params(key, in_channel, out_channel, dtype=jnp.float32):
    """torch-style init: Linear U(-1/sqrt(in), 1/sqrt(in)); LN affine randomized
    slightly so the affine path is actually exercised by the self-test."""
    k1, k2, k3, k4 = jax.random.split(key, 4)
    bound = 1.0 / (in_channel ** 0.5)
    w1 = jax.random.uniform(k1, (out_channel, in_channel), dtype, -bound, bound)
    b1 = jax.random.uniform(k2, (out_channel, 1), dtype, -bound, bound)
    ln_w = jnp.ones((out_channel, 1), dtype) + 0.1 * jax.random.normal(k3, (out_channel, 1), dtype)
    ln_b = 0.1 * jax.random.normal(k4, (out_channel, 1), dtype)
    return (w1, b1, ln_w, ln_b)


def upsample_convnext_ref(x_nchw, params, *, ratio=1, eps=1e-6):
    """Pure-JAX reference mirroring the PyTorch forward."""
    w1, b1, ln_w, ln_b = params
    y = jnp.transpose(x_nchw, (0, 2, 3, 1))                 # NHWC
    y = y @ w1.T + b1.reshape(-1)                           # Linear (torch layout)
    mean = jnp.mean(y, -1, keepdims=True)
    var = jnp.mean((y - mean) ** 2, -1, keepdims=True)      # biased variance
    y = (y - mean) / jnp.sqrt(var + eps)
    y = y * ln_w.reshape(-1) + ln_b.reshape(-1)
    y = jnp.transpose(y, (0, 3, 1, 2))                      # NCHW
    s = 2 ** ratio
    return jnp.repeat(jnp.repeat(y, s, axis=2), s, axis=3)  # nearest upsample


if __name__ == "__main__":
    N, C, H, W = 2, 4, 16, 16
    out_c = 32
    ratio = 1

    key = jax.random.PRNGKey(0)
    kx, kp, kx2 = jax.random.split(key, 3)
    x = jax.random.normal(kx, (N, C, H, W), jnp.float32)
    params = init_params(kp, C, out_c)

    ref = upsample_convnext_ref(x, params, ratio=ratio)

    # f32 MXU path: tight check against the reference.
    out_f32 = jax.block_until_ready(
        upsample_convnext(x, params, ratio=ratio, use_bf16_matmul=False))
    assert out_f32.shape == ref.shape
    assert jnp.allclose(out_f32, ref, atol=2e-4, rtol=2e-3), "mismatch (f32 path)"

    # default bf16-MXU path (perf feedback): slightly looser tolerance.
    out_bf16 = jax.block_until_ready(upsample_convnext(x, params, ratio=ratio))
    assert jnp.allclose(out_bf16, ref, atol=5e-2, rtol=5e-2), "mismatch (bf16 MXU path)"

    # ragged spatial extent (H*W = 144 is not a multiple of the 128-lane tile)
    # and a larger upsample ratio.
    x2 = jax.random.normal(kx2, (N, C, 12, 12), jnp.float32)
    ref2 = upsample_convnext_ref(x2, params, ratio=2)
    out2 = jax.block_until_ready(
        upsample_convnext(x2, params, ratio=2, use_bf16_matmul=False))
    assert jnp.allclose(out2, ref2, atol=2e-4, rtol=2e-3), "mismatch (ragged H*W)"

    print("KERNEL_OK")
</pallas_src>

<mosaic_0001>
module attributes {stable_mosaic.version = 11 : i64} {
  func.func @_linear_layernorm_kernel(%arg0: i32, %arg1: i32, %arg2: memref<1x4x256xf32, #tpu.memory_space<vmem>>, %arg3: memref<32x4xf32, #tpu.memory_space<vmem>>, %arg4: memref<32x1xf32, #tpu.memory_space<vmem>>, %arg5: memref<32x1xf32, #tpu.memory_space<vmem>>, %arg6: memref<32x1xf32, #tpu.memory_space<vmem>>, %arg7: memref<1x32x256xf32, #tpu.memory_space<vmem>>) attributes {dimension_semantics = [#tpu.dimension_semantics<parallel>, #tpu.dimension_semantics<parallel>], iteration_bounds = array<i64: 2, 1>, scalar_prefetch = 0 : i64, scratch_operands = 0 : i64, tpu.core_type = #tpu.core_type<tc>, window_params = [{transform_indices = @transform_0, window_bounds = array<i64: 1, 4, 256>}, {pipeline_mode = #tpu.pipeline_mode<synchronous>, transform_indices = @transform_1, window_bounds = array<i64: 32, 4>}, {pipeline_mode = #tpu.pipeline_mode<synchronous>, transform_indices = @transform_2, window_bounds = array<i64: 32, 1>}, {pipeline_mode = #tpu.pipeline_mode<synchronous>, transform_indices = @transform_3, window_bounds = array<i64: 32, 1>}, {pipeline_mode = #tpu.pipeline_mode<synchronous>, transform_indices = @transform_4, window_bounds = array<i64: 32, 1>}, {transform_indices = @transform_5, window_bounds = array<i64: 1, 32, 256>}]} {
    %c0 = arith.constant 0 : index
    %c0_0 = arith.constant 0 : index
    %c0_1 = arith.constant 0 : index
    %0 = vector.load %arg2[%c0, %c0_0, %c0_1] : memref<1x4x256xf32, #tpu.memory_space<vmem>>, vector<1x4x256xf32>
    %1 = vector.shape_cast %0 : vector<1x4x256xf32> to vector<4x256xf32>
    %c0_2 = arith.constant 0 : index
    %c0_3 = arith.constant 0 : index
    %2 = vector.load %arg3[%c0_2, %c0_3] : memref<32x4xf32, #tpu.memory_space<vmem>>, vector<32x4xf32>
    %cst = arith.constant dense<0.000000e+00> : vector<32x256xf32>
    %3 = tpu.matmul %2, %1, %cst {dimension_numbers = #tpu.dot_dimension_numbers<[1], [0], [0], [1], [0, 0, 1, 1], [], []>} : vector<32x4xf32>, vector<4x256xf32>, vector<32x256xf32> -> vector<32x256xf32>
    %c0_4 = arith.constant 0 : index
    %c0_5 = arith.constant 0 : index
    %4 = vector.load %arg4[%c0_4, %c0_5] : memref<32x1xf32, #tpu.memory_space<vmem>>, vector<32x1xf32>
    %5 = vector.broadcast %4 : vector<32x1xf32> to vector<32x256xf32>
    %6 = arith.addf %3, %5 : vector<32x256xf32>
    %cst_6 = arith.constant dense<0.000000e+00> : vector<256xf32>
    %7 = vector.multi_reduction <add>, %6, %cst_6 [0] : vector<32x256xf32> to vector<256xf32>
    %8 = vector.shape_cast %7 : vector<256xf32> to vector<1x256xf32>
    %9 = arith.mulf %6, %6 : vector<32x256xf32>
    %cst_7 = arith.constant dense<0.000000e+00> : vector<256xf32>
    %10 = vector.multi_reduction <add>, %9, %cst_7 [0] : vector<32x256xf32> to vector<256xf32>
    %11 = vector.shape_cast %10 : vector<256xf32> to vector<1x256xf32>
    %cst_8 = arith.constant 3.125000e-02 : f32
    %12 = vector.broadcast %cst_8 : f32 to vector<1x256xf32>
    %13 = arith.mulf %8, %12 : vector<1x256xf32>
    %cst_9 = arith.constant 3.125000e-02 : f32
    %14 = vector.broadcast %cst_9 : f32 to vector<1x256xf32>
    %15 = arith.mulf %11, %14 : vector<1x256xf32>
    %16 = arith.mulf %13, %13 : vector<1x256xf32>
    %17 = arith.subf %15, %16 : vector<1x256xf32>
    %18 = vector.broadcast %13 : vector<1x256xf32> to vector<32x256xf32>
    %19 = arith.subf %6, %18 : vector<32x256xf32>
    %cst_10 = arith.constant 9.99999997E-7 : f32
    %20 = vector.broadcast %cst_10 : f32 to vector<1x256xf32>
    %21 = arith.addf %17, %20 : vector<1x256xf32>
    %22 = math.rsqrt %21 : vector<1x256xf32>
    %23 = vector.broadcast %22 : vector<1x256xf32> to vector<32x256xf32>
    %24 = arith.mulf %19, %23 : vector<32x256xf32>
    %c0_11 = arith.constant 0 : index
    %c0_12 = arith.constant 0 : index
    %25 = vector.load %arg5[%c0_11, %c0_12] : memref<32x1xf32, #tpu.memory_space<vmem>>, vector<32x1xf32>
    %26 = vector.broadcast %25 : vector<32x1xf32> to vector<32x256xf32>
    %27 = arith.mulf %24, %26 : vector<32x256xf32>
    %c0_13 = arith.constant 0 : index
    %c0_14 = arith.constant 0 : index
    %28 = vector.load %arg6[%c0_13, %c0_14] : memref<32x1xf32, #tpu.memory_space<vmem>>, vector<32x1xf32>
    %29 = vector.broadcast %28 : vector<32x1xf32> to vector<32x256xf32>
    %30 = arith.addf %27, %29 : vector<32x256xf32>
    %c0_15 = arith.constant 0 : index
    %c0_16 = arith.constant 0 : index
    %c0_17 = arith.constant 0 : index
    %31 = vector.load %arg7[%c0_15, %c0_16, %c0_17] : memref<1x32x256xf32, #tpu.memory_space<vmem>>, vector<1x32x256xf32>
    %32 = vector.shape_cast %31 : vector<1x32x256xf32> to vector<32x256xf32>
    %33 = vector.shape_cast %30 : vector<32x256xf32> to vector<1x32x256xf32>
    tpu.vector_store %arg7[%c0_15, %c0_16, %c0_17], %33 {strides = array<i32>} : memref<1x32x256xf32, #tpu.memory_space<vmem>>, vector<1x32x256xf32>,
    return
  }
  func.func @transform_0(%arg0: i32, %arg1: i32) -> (i32, i32, i32) {
    %c0_i32 = arith.constant 0 : i32
    %c0_i32_0 = arith.constant 0 : i32
    return %arg0, %c0_i32, %arg1 : i32, i32, i32
  }
  func.func @transform_1(%arg0: i32, %arg1: i32) -> (i32, i32) {
    %c0_i32 = arith.constant 0 : i32
    %c0_i32_0 = arith.constant 0 : i32
    %c0_i32_1 = arith.constant 0 : i32
    return %c0_i32, %c0_i32_0 : i32, i32
  }
  func.func @transform_2(%arg0: i32, %arg1: i32) -> (i32, i32) {
    %c0_i32 = arith.constant 0 : i32
    %c0_i32_0 = arith.constant 0 : i32
    %c0_i32_1 = arith.constant 0 : i32
    return %c0_i32, %c0_i32_0 : i32, i32
  }
  func.func @transform_3(%arg0: i32, %arg1: i32) -> (i32, i32) {
    %c0_i32 = arith.constant 0 : i32
    %c0_i32_0 = arith.constant 0 : i32
    %c0_i32_1 = arith.constant 0 : i32
    return %c0_i32, %c0_i32_0 : i32, i32
  }
  func.func @transform_4(%arg0: i32, %arg1: i32) -> (i32, i32) {
    %c0_i32 = arith.constant 0 : i32
    %c0_i32_0 = arith.constant 0 : i32
    %c0_i32_1 = arith.constant 0 : i32
    return %c0_i32, %c0_i32_0 : i32, i32
  }
  func.func @transform_5(%arg0: i32, %arg1: i32) -> (i32, i32, i32) {
    %c0_i32 = arith.constant 0 : i32
    %c0_i32_0 = arith.constant 0 : i32
    return %arg0, %c0_i32, %arg1 : i32, i32, i32
  }
}

</mosaic_0001>

<bundles_post_ra>
// kernel: tpu_custom_call.1
= control target key start
LH: loop header
LB: loop body
LE: loop exit
PB: predicated region body
PF: predicated region fallthrough
CT: control target
= control target key end

     0   :  { %10 = vsyncpa [#allocation3], 0  ;;  %s1033_s0 = inlined_call_operand.vmem [shape: f32[2,4,256], index: 0, kind: input, shape index: {}]   ;;  %s1034_s1 = inlined_call_operand.vmem [shape: f32[32,4], index: 1, kind: input, shape index: {}]   ;;  %s1035_s2 = inlined_call_operand.vmem [shape: f32[32,1], index: 2, kind: input, shape index: {}]   ;;  %s1036_s3 = inlined_call_operand.vmem [shape: f32[32,1], index: 3, kind: input, shape index: {}]   ;;  %s1037_s4 = inlined_call_operand.vmem [shape: f32[32,1], index: 4, kind: input, shape index: {}]   ;;  %s1038_s5 = inlined_call_operand.hbm [shape: f32[2,32,256], index: 5, kind: output, shape index: {}]  }
   0x1   :  { %12 = vsyncpa [#allocation3 + $0x1], 0  ;;  %s827_s18 = smov 0   ;;  %s829_s19 = smov 0  }
   0x2   :  { %s831_s20 = smov 0   ;;  %s833_s21 = smov 0  }
   0x3   :  { %s835_s22 = smov 0   ;;  %s837_s23 = smov 0  }
   0x4 LB: > { %s622_s24 = sadd.s32 4294967295, %s792_s23   ;;  %s623_s25 = sadd.s32 4294967294, %s792_s23   ;;  %s792_s23 = sphi %s837_s23, %s18_s23   ;;  %s788_s22 = sphi %s835_s22, %s1045_s22   ;;  %s784_s21 = sphi %s833_s21, %s1044_s21   ;;  %s780_s20 = sphi %s831_s20, %s1043_s20   ;;  %s776_s19 = sphi %s829_s19, %s1042_s19   ;;  %s772_s18 = sphi %s827_s18, %s1041_s18  }
   0x5   : > { %s30_s26 = sadd.s32 1, %s788_s22  ;;  %s151_s27 = sadd.s32 1, %s780_s20 }
   0x6   : > { %p32_p0 = scmp.ge.s32.totalorder %s30_s26, 2  ;;  %p161_p1 = scmp.ne.s32.totalorder %s780_s20, %s776_s19 }
   0x7   : > { %p162_p2 = scmp.eq.s32.totalorder %s622_s24, 1  ;;  %p167_p3 = scmp.ne.s32.totalorder %s776_s19, %s772_s18 }
   0x8   : > { %s1047_s26 = smov (%p32_p0, %s30_s26), 0  ;;  %p168_p5 = scmp.eq.s32.totalorder %s623_s25, 1 }
   0x9   : > { %p867_p4 = por %p162_p2, %p161_p1  ;;  %s146_s29 = ssub.s32 %s788_s22, %s1047_s26 }
   0xa   : > { %p626_p6 = scmp.ge.s32.totalorder %s792_s23, 1  ;;  %p149_p7 = scmp.eq.s32.totalorder %s146_s29, 0 }
   0xb   : > { %p874_p8 = por %p168_p5, %p167_p3  ;;  %p211_p9 = scmp.lt.s32.totalorder %s792_s23, 3 }
   0xc   : > { %s880_s6 = scalar_select %p149_p7, %s780_s20, %s151_s27  }
   0xd   : > { %p212_p10 = pnand %p626_p6, %p211_p9 }
   0xe   : > { %p244_p11 = scmp.lt.s32.totalorder (!%p212_p10), %s784_s21, 1  ;;  %s240_s14 = sand.u32 (!%p212_p10), 1, %s776_s19  }
   0xf   : > { %215 = sbr.rel (%p212_p10) target bundleno = 234 (0xea), region = 40  ;;  %s627_s15 = sshll.u32 (!%p212_p10), %s240_s14, 6 }
  0x10   : > { %s646_s16 = sshll.u32 (!%p212_p10), %s784_s21, 6  ;;  %s526_s7 = scalar_lea.sflag (!%p212_p10), [#allocation3], %s240_s14 }
  0x11   : > { %s539_s25 = scalar_lea.hbm (!%p212_p10), %s1038_s5, %s646_s16 }
  0x12   : > { %s542_s29 = sshll.u32 (!%p212_p10), %s539_s25, 4  ;;  %s543_s29 = int_to_ptr.hbm [resolvable:$true] %s542_s29 }
  0x13   : > { %s728_s8 = sshra.s32 (!%p212_p10), %s543_s29, 4  ;;  %s729_s8 = int_to_ptr.hbm [resolvable:$true] %s728_s8 }
  0x14   : > { %v259_v0 = vld [vmem:[%s1035_s2] sm:$0xff]  ;;  %v261_v1 = vld [vmem:[%s1035_s2 + $0x10] sm:$0xff]  ;;  %v794_v2 = vmov 0   ;;  %s245_s11 = scalar_select %p244_p11, %s784_s21, 1  ;;  %v260_v5 = vld [vmem:[%s1035_s2 + $0x8] sm:$0xff]  ;;  %vm300_vm0 = vcmask 1043456  }
  0x15   : > { %707 = vset.pattern.permute.xlu0 %v794_v2  ;;  %708 = vset.pattern.permute.xlu1 %v794_v2  ;;  %v453_v3 = vld [vmem:[%s1036_s3] sm:$0xff]  ;;  %v262_v6 = vld [vmem:[%s1035_s2 + $0x18] sm:$0xff]  ;;  %v454_v7 = vld [vmem:[%s1036_s3 + $0x8] sm:$0xff]  ;;  %vm287_vm1 = vcmask 31744   ;;  %s242_s21 = scalar_lea.vmem [#allocation2], %s627_s15  ;;  %s730_s9 = scalar_lea.hbm %s729_s8, 64 }
  0x16   : > { %265 = vperm.xlu0 %707, %v259_v0   ;;  %275 = vperm.xlu1 %708, %v261_v1   ;;  %s645_s12 = sshll.u32 %s245_s11, 3  ;;  %v255_v8 = vld [vmem:[%s1034_s1] sm:$0xff]  ;;  %v257_v9 = vld [vmem:[%s1034_s1 + $0x10] sm:$0xff]  ;;  %v456_v13 = vld [vmem:[%s1036_s3 + $0x18] sm:$0xff]  ;;  %s540_s27 = sshll.u32 %s242_s21, 4  ;;  %s541_s27 = int_to_ptr.vmem [resolvable:$true] %s540_s27 }
  0x17   : > { %709 = vset.pattern.permute.xlu2 %v794_v2  ;;  %s251_s17 = scalar_lea.vmem %s1033_s0, %s645_s12  ;;  %v455_v12 = vld [vmem:[%s1036_s3 + $0x10] sm:$0xff]  ;;  %v485_v14 = vld [vmem:[%s1037_s4] sm:$0xff]  ;;  %v256_v15 = vld [vmem:[%s1034_s1 + $0x8] sm:$0xff]  ;;  %p731_p12 = scmp.ne.s32.totalorder %s729_s8, %s730_s9 }
  0x18   : > { %459 = vperm.xlu2 %709, %v453_v3   ;;  %v254_v4 = vld [vmem:[%s251_s17] sm:$0xff]  ;;  %v258_v16 = vld [vmem:[%s1034_s1 + $0x18] sm:$0xff]  ;;  %v486_v17 = vld [vmem:[%s1037_s4 + $0x8] sm:$0xff]  ;;  %s734_s12 = scalar_lea.hbm %s1038_s5, 128  ;;  %p735_p1 = scmp.lt.s32.totalorder %s729_s8, %s1038_s5 }
  0x19   : > { %284 = vst [vmem:[#allocation1] ss:$2 sm:$0xff] %v254_v4  ;;  %v487_v18 = vld [vmem:[%s1037_s4 + $0x10] sm:$0xff]  ;;  %v488_v19 = vld [vmem:[%s1037_s4 + $0x18] sm:$0xff]  ;;  %p732_p13 = pnand %p731_p12, %p867_p4  ;;  %p736_p2 = scmp.lt.s32.totalorder %s734_s12, %s730_s9 }
  0x1b   : > { %p733_p0 = pneg %p732_p13  ;;  %p737_p3 = por %p736_p2, %p735_p1 }
  0x1d   : > { %p738_p5 = pnand %p737_p3, %p733_p0 }
  0x1e   : > { %270 = vperm.xlu0 %707, %v260_v5   ;;  %280 = vperm.xlu1 %708, %v262_v6  }
  0x20   : > { %464 = vperm.xlu2 %709, %v454_v7   ;;  %v285_v10 = vld.sshfl [vmem:[#allocation1] sm:$0xff pattern:$0x75316420]  ;;  %v286_v11 = vld.sshfl [vmem:[#allocation1 + $0x8] sm:$0xff pattern:$0x75316420] }
  0x21   : > { %630 = vmatpush.msk.msra.mxu0 %vm300_vm0, %v285_v10  ;;  %647 = vmatpush.msk.msra.mxu2 %vm300_vm0, %v285_v10 }
  0x22   : > { %635 = vmatpush.msk.msra.mxu1 %vm300_vm0, %v286_v11  ;;  %648 = vmatpush.msk.msra.mxu3 %vm300_vm0, %v286_v11 }
  0x23   : > { %631 = vmatmul.msk.f32.vlgmr.msra.gmra.mxu0 %vm287_vm1, %v255_v8  ;;  %633 = vmatmul.msk.f32.vlgmr.msra.gmra.mxu2 %vm287_vm1, %v257_v9 }
  0x24   : > { %636 = vmatmul.msk.f32.vlgmr.msra.gmra.mxu1 %vm287_vm1, %v255_v8  ;;  %638 = vmatmul.msk.f32.vlgmr.msra.gmra.mxu3 %vm287_vm1, %v257_v9 }
  0x26   : > { %469 = vperm.xlu0 %707, %v455_v12   ;;  %474 = vperm.xlu1 %708, %v456_v13  }
  0x28   : > { %491 = vperm.xlu2 %709, %v485_v14  }
  0x2b   : > { %632 = vmatmul.msk.f32.gmra.mxu0 %vm287_vm1, %v256_v15  ;;  %634 = vmatmul.msk.f32.gmra.mxu2 %vm287_vm1, %v258_v16 }
  0x2c   : > { %637 = vmatmul.msk.f32.gmra.mxu1 %vm287_vm1, %v256_v15  ;;  %639 = vmatmul.msk.f32.gmra.mxu3 %vm287_vm1, %v258_v16 }
  0x2e   : > { %496 = vperm.xlu0 %707, %v486_v17   ;;  %501 = vperm.xlu1 %708, %v487_v18  }
  0x30   : > { %506 = vperm.xlu2 %709, %v488_v19  }
  0x88   : > { %v266_v20 = vpop.permute.xlu0 %265  ;;  %v276_v23 = vpop.permute.xlu1 %275 }
  0x90   : > { %v271_v27 = vpop.permute.xlu0 %270  ;;  %v281_v42 = vpop.permute.xlu1 %280 }
  0xa0   : > { %v322_v21 = vpop.f32.mrf.mxu0 }
  0xa1   : > { %v351_v22 = vpop.f32.mrf.mxu1  ;;  %v943_v25 = vadd.f32 %v322_v21, %v266_v20 }
  0xa2   : > { %v945_v28 = vadd.f32 %v351_v22, %v266_v20 }
  0xa3   : > { %v381_v33 = vmul.f32 %v943_v25, %v943_v25 }
  0xa4   : > { %v382_v37 = vmul.f32 %v945_v28, %v945_v28 }
  0xa6   : > { %v328_v24 = vpop.f32.mrf.mxu2 }
  0xa7   : > { %v357_v26 = vpop.f32.mrf.mxu3  ;;  %v953_v34 = vadd.f32 %v328_v24, %v276_v23  ;;  %v460_v24 = vpop.permute.xlu2 %459 }
  0xa8   : > { %v325_v29 = vpop.f32.mrf.mxu0  ;;  %v961_v38 = vadd.f32 %v357_v26, %v276_v23 }
  0xa9   : > { %v947_v30 = vadd.f32 %v325_v29, %v271_v27  ;;  %v354_v31 = vpop.f32.mrf.mxu1  ;;  %v385_v45 = vmul.f32 %v953_v34, %v953_v34 }
  0xaa   : > { %v949_v32 = vadd.f32 %v354_v31, %v271_v27  ;;  %v386_v49 = vmul.f32 %v961_v38, %v961_v38 }
  0xab   : > { %v363_v35 = vadd.f32 %v947_v30, %v943_v25  ;;  %v383_v36 = vmul.f32 %v947_v30, %v947_v30 }
  0xac   : > { %v372_v39 = vadd.f32 %v949_v32, %v945_v28  ;;  %v384_v40 = vmul.f32 %v949_v32, %v949_v32 }
  0xad   : > { %v389_v41 = vadd.f32 %v383_v36, %v381_v33  ;;  %v364_v47 = vadd.f32 %v363_v35, %v953_v34 }
  0xae   : > { %v398_v43 = vadd.f32 %v384_v40, %v382_v37  ;;  %v331_v44 = vpop.f32.mrf.mxu2  ;;  %v373_v51 = vadd.f32 %v372_v39, %v961_v38 }
  0xaf   : > { %v969_v46 = vadd.f32 %v331_v44, %v281_v42  ;;  %v360_v48 = vpop.f32.mrf.mxu3  ;;  %v390_v54 = vadd.f32 %v389_v41, %v385_v45  ;;  %v465_v36 = vpop.permute.xlu2 %464 }
  0xb0   : > { %v974_v50 = vadd.f32 %v360_v48, %v281_v42  ;;  %v399_v57 = vadd.f32 %v398_v43, %v386_v49  ;;  %v470_v44 = vpop.permute.xlu0 %469  ;;  %v475_v45 = vpop.permute.xlu1 %474 }
  0xb1   : > { %v365_v52 = vadd.f32 %v364_v47, %v969_v46  ;;  %v387_v53 = vmul.f32 %v969_v46, %v969_v46 }
  0xb2   : > { %v374_v55 = vadd.f32 %v373_v51, %v974_v50  ;;  %v388_v56 = vmul.f32 %v974_v50, %v974_v50 }
  0xb3   : > { %v366_v58 = vrot.slane %v365_v52, 4  ;;  %v391_v59 = vadd.f32 %v390_v54, %v387_v53 }
  0xb4   : > { %v375_v60 = vrot.slane %v374_v55, 4  ;;  %v400_v61 = vadd.f32 %v399_v57, %v388_v56 }
  0xb5   : > { %v367_v62 = vadd.f32 %v366_v58, %v365_v52  ;;  %v392_v63 = vrot.slane %v391_v59, 4 }
  0xb6   : > { %v376_v0 = vadd.f32 %v375_v60, %v374_v55  ;;  %v401_v1 = vrot.slane %v400_v61, 4 }
  0xb7   : > { %v368_v2 = vrot.slane %v367_v62, 2  ;;  %v393_v3 = vadd.f32 %v392_v63, %v391_v59  ;;  %v492_v56 = vpop.permute.xlu2 %491 }
  0xb8   : > { %v377_v4 = vrot.slane %v376_v0, 2  ;;  %v402_v5 = vadd.f32 %v401_v1, %v400_v61 }
  0xb9   : > { %v369_v6 = vadd.f32 %v368_v2, %v367_v62  ;;  %v394_v7 = vrot.slane %v393_v3, 2 }
  0xba   : > { %v378_v8 = vadd.f32 %v377_v4, %v376_v0  ;;  %v403_v9 = vrot.slane %v402_v5, 2 }
  0xbb   : > { %v370_v10 = vrot.slane %v369_v6, 1  ;;  %v395_v11 = vadd.f32 %v394_v7, %v393_v3 }
  0xbc   : > { %v379_v12 = vrot.slane %v378_v8, 1  ;;  %v404_v13 = vadd.f32 %v403_v9, %v402_v5  ;;  %v497_v5 = vpop.permute.xlu0 %496 }
  0xbd   : > { %v371_v14 = vadd.f32 %v370_v10, %v369_v6  ;;  %v396_v15 = vrot.slane %v395_v11, 1  ;;  %v502_v6 = vpop.permute.xlu1 %501 }
  0xbe   : > { %v380_v16 = vadd.f32 %v379_v12, %v378_v8  ;;  %v405_v17 = vrot.slane %v404_v13, 1 }
  0xbf   : > { %v397_v18 = vadd.f32 %v396_v15, %v395_v11  ;;  %v407_v19 = vmul.f32 0.03125, %v371_v14 }
  0xc0   : > { %v406_v20 = vadd.f32 %v405_v17, %v404_v13  ;;  %v408_v21 = vmul.f32 0.03125, %v380_v16  ;;  %v507_v17 = vpop.permute.xlu2 %506 }
  0xc1   : > { %v409_v22 = vmul.f32 0.03125, %v397_v18  ;;  %v411_v23 = vmul.f32 %v407_v19, %v407_v19  ;;  %v421_v51 = vsub.f32 %v969_v46, %v407_v19  ;;  %v417_v54 = vsub.f32 %v947_v30, %v407_v19 }
  0xc2   : > { %v410_v26 = vmul.f32 0.03125, %v406_v20  ;;  %v412_v27 = vmul.f32 %v408_v21, %v408_v21  ;;  %v422_v53 = vsub.f32 %v974_v50, %v408_v21  ;;  %v419_v57 = vsub.f32 %v953_v34, %v407_v19 }
  0xc3   : > { %v413_v29 = vsub.f32 %v409_v22, %v411_v23  ;;  %v415_v59 = vsub.f32 %v943_v25, %v407_v19  ;;  %v418_v46 = vsub.f32 %v949_v32, %v408_v21  ;;  %v420_v60 = vsub.f32 %v961_v38, %v408_v21 }
  0xc4   : > { %v414_v31 = vsub.f32 %v410_v26, %v412_v27  ;;  %v416_v30 = vsub.f32 %v945_v28, %v408_v21 }
  0xc5   : > { %v423_v33 = vadd.f32 1e-06, %v413_v29 }
  0xc6   : > { %v424_v35 = vadd.f32 1e-06, %v414_v31 }
  0xc7   : > { %710 = vrsqrt.f32 %v423_v33  ;;  %vm431_vm4 = vweird.f32 %v423_v33 }
  0xc8   : > { %712 = vrsqrt.f32 %v424_v35  ;;  %vm441_vm6 = vweird.f32 %v424_v35 }
  0xcd   : > { %v711_v37 = vpop.eup %710 }
  0xce   : > { %v713_v39 = vpop.eup %712  ;;  %v426_v40 = vmul.f32 %v711_v37, %v423_v33  ;;  %vm432_vm2 = vweird.f32 %v711_v37 }
  0xcf   : > { %v436_v41 = vmul.f32 %v713_v39, %v424_v35  ;;  %vm442_vm3 = vweird.f32 %v713_v39  ;;  %vm433_vm5 = vmor %vm431_vm4, %vm432_vm2 }
  0xd0   : > { %v427_v42 = vmul.f32 %v711_v37, %v426_v40  ;;  %vm443_vm7 = vmor %vm441_vm6, %vm442_vm3 }
  0xd1   : > { %v437_v43 = vmul.f32 %v713_v39, %v436_v41 }
  0xd2   : > { %v428_v47 = vmul.f32 0.5, %v427_v42 }
  0xd3   : > { %v438_v48 = vmul.f32 0.5, %v437_v43 }
  0xd4   : > { %v429_v49 = vsub.f32 1.5, %v428_v47 }
  0xd5   : > { %v439_v52 = vsub.f32 1.5, %v438_v48 }
  0xd6   : > { %v430_v55 = vmul.f32 %v711_v37, %v429_v49 }
  0xd7   : > { %v440_v58 = vmul.f32 %v713_v39, %v439_v52 }
  0xd8   : > { %v434_v50 = vsel %vm433_vm5, %v711_v37, %v430_v55 }
  0xd9   : > { %v444_v61 = vsel %vm443_vm7, %v713_v39, %v440_v58  ;;  %v447_v62 = vmul.f32 %v434_v50, %v417_v54  ;;  %v449_v34 = vmul.f32 %v434_v50, %v419_v57  ;;  %v445_v63 = vmul.f32 %v434_v50, %v415_v59 }
  0xda   : > { %v448_v0 = vmul.f32 %v444_v61, %v418_v46  ;;  %v450_v1 = vmul.f32 %v444_v61, %v420_v60  ;;  %v446_v2 = vmul.f32 %v444_v61, %v416_v30  ;;  %v451_v3 = vmul.f32 %v434_v50, %v421_v51 }
  0xdb   : > { %v479_v25 = vmul.f32 %v465_v36, %v447_v62  ;;  %v481_v32 = vmul.f32 %v470_v44, %v449_v34  ;;  %v477_v4 = vmul.f32 %v460_v24, %v445_v63  ;;  %v452_v38 = vmul.f32 %v444_v61, %v422_v53 }
  0xdc   : > { %v480_v7 = vmul.f32 %v465_v36, %v448_v0  ;;  %v482_v8 = vmul.f32 %v470_v44, %v450_v1  ;;  %v478_v28 = vmul.f32 %v460_v24, %v446_v2  ;;  %v483_v11 = vmul.f32 %v475_v45, %v451_v3 }
  0xdd   : > { %v511_v9 = vadd.f32 %v497_v5, %v479_v25  ;;  %v513_v10 = vadd.f32 %v502_v6, %v481_v32  ;;  %v484_v14 = vmul.f32 %v475_v45, %v452_v38  ;;  %v509_v15 = vadd.f32 %v492_v56, %v477_v4 }
  0xde   : > { %v512_v12 = vadd.f32 %v497_v5, %v480_v7  ;;  %v514_v13 = vadd.f32 %v502_v6, %v482_v8  ;;  %v510_v16 = vadd.f32 %v492_v56, %v478_v28  ;;  %v515_v18 = vadd.f32 %v507_v17, %v483_v11 }
  0xdf   : > { %519 = vst [vmem:[%s242_s21 + $0x10] sm:$0xff] %v511_v9  ;;  %v516_v19 = vadd.f32 %v507_v17, %v484_v14 }
  0xe0   : > { %520 = vst [vmem:[%s242_s21 + $0x18] sm:$0xff] %v512_v12 }
  0xe1   : > { %521 = vst [vmem:[%s242_s21 + $0x20] sm:$0xff] %v513_v10 }
  0xe2   : > { %522 = vst [vmem:[%s242_s21 + $0x28] sm:$0xff] %v514_v13 }
  0xe3   : > { %517 = vst [vmem:[%s242_s21] sm:$0xff] %v509_v15 }
  0xe4   : > { %518 = vst [vmem:[%s242_s21 + $0x8] sm:$0xff] %v510_v16 }
  0xe5   : > { %523 = vst [vmem:[%s242_s21 + $0x30] sm:$0xff] %v515_v18 }
  0xe6   : > { %524 = vst [vmem:[%s242_s21 + $0x38] sm:$0xff] %v516_v19 }
  0xe7   : > { %741 = shalt.err (!%p738_p5)
}
  0xe8   : > { %s795_s14 = smov 256   ;;  %s796_s16 = smov 16  }
  0xe9   : > { %649 = dma.vmem_to_hbm [thread:$0]  (%p867_p4), %s541_s27, 1024, %s543_s29, %s526_s7, %s795_s14, %s795_s14, %s796_s16  }
  0xea PF: > { %p655_p6 = scmp.ge.s32.totalorder %s792_s23, 2  ;;  %s557_s17 = sand.u32 1, %s772_s18  }
  0xeb   : > { %s558_s24 = scalar_lea.sflag [#allocation3], %s557_s17 }
  0xec   : > { %p652_p7 = pnand %p655_p6, %p874_p8 }
  0xee   : > { %p653_p9 = pneg %p652_p7 }
  0xf0   : > { %767 = dma.done.wait (%p653_p9), %s558_s24, 1024  }
  0xf1   : > { %769 = vsyncadd (%p653_p9), %s558_s24, 4294966272  ;;  %s18_s23 = sadd.s32 1, %s792_s23   ;;  %s1041_s18 = smov %s776_s19 }
  0xf2   : > { %p15_p10 = scmp.ge.s32.totalorder %s18_s23, 4   ;;  %s1042_s19 = smov %s780_s20 }
  0xf3   : > { %s1043_s20 = smov %s880_s6  ;;  %s1044_s21 = smov %s788_s22 }
  0xf4   : > { %s1045_s22 = smov %s1047_s26  ;;  %17 = sbr.rel (!%p15_p10) target bundleno = 4 (0x4), region = 75 }
  0xf9   :  { %564 = vsyncpa [#allocation3], 1 }
  0xfa   :  { %566 = vsyncpa [#allocation3 + $0x1], 1 }

</bundles_post_ra>
